<compile_context>
chip_gen: v7x
topology: tpu7x:2x2x1
jax: 0.10.0
libtpu: 0.0.40
codegen_flags: <defaults>
</compile_context>

<pallas_src>
import jax
import jax.numpy as jnp
from jax.experimental import pallas as pl
from jax.experimental.pallas import tpu as pltpu

_LANES = 128
_TARGET_BLOCK_BYTES = 4 * 1024 * 1024   # ~4 MiB per operand block
_VMEM_LIMIT_BYTES = 32 * 1024 * 1024    # 2 bufs x (in+out) x 4 MiB = 16 MiB << 32 MiB
_SMALL_N = 1 << 21                      # < 2M elements: let XLA fuse the where()


def _round_up(x: int, m: int) -> int:
    return ((x + m - 1) // m) * m


def _binarize_kernel(x_ref, o_ref):
    x = x_ref[...]
    one = jnp.ones((), dtype=x.dtype)
    o_ref[...] = jnp.where(x >= 0, one, -one)


def binarize(x: jax.Array, *, force_pallas: bool = False) -> jax.Array:
    """Elementwise binarize to {-1, +1}; preserves shape and dtype.

    force_pallas=True skips the small-input XLA fallback (used for testing the
    kernel path on small shapes).
    """
    orig_shape = x.shape
    dtype = x.dtype
    n = x.size

    # Small-input fallback: the pallas_call custom-call boundary would both
    # dominate runtime and block fusion with adjacent ops.
    if n == 0 or (not force_pallas and n < _SMALL_N):
        one = jnp.ones((), dtype=dtype)
        return jnp.where(x >= 0, one, -one)

    itemsize = jnp.dtype(dtype).itemsize
    packing = max(1, 4 // itemsize)
    sublane_tile = 8 * packing          # 8 f32, 16 bf16, 32 int8/fp8

    flat = x.reshape(-1)

    # Pad only to lane (128) granularity; most activation sizes are already
    # multiples of 128, so the pad and the trailing slice are usually skipped.
    padded_n = _round_up(n, _LANES)
    needs_pad = padded_n != n
    if needs_pad:
        # TODO(synk): a 1D BlockSpec with a masked partial final block would
        # avoid this extra HBM pass entirely; kept 2D for robust lowering on
        # all generations.
        flat = jnp.pad(flat, (0, padded_n - n))

    rows = padded_n // _LANES

    # Byte-sized blocks: ~4 MiB each. Derive the step count first so it can be
    # forced even (v7x has 2 TensorCores sharing the "parallel" grid axis),
    # then round the per-step rows to the dtype's native sublane tile.
    target_rows = max(sublane_tile, _TARGET_BLOCK_BYTES // (_LANES * itemsize))
    steps = max(1, pl.cdiv(rows, target_rows))
    if steps > 1 and steps % 2 == 1:
        steps += 1
    row_tile = _round_up(pl.cdiv(rows, steps), sublane_tile)
    grid = (pl.cdiv(rows, row_tile),)

    out2d = pl.pallas_call(
        _binarize_kernel,
        out_shape=jax.ShapeDtypeStruct((rows, _LANES), dtype),
        grid=grid,
        in_specs=[pl.BlockSpec((row_tile, _LANES), lambda i: (i, 0))],
        out_specs=pl.BlockSpec((row_tile, _LANES), lambda i: (i, 0)),
        compiler_params=pltpu.CompilerParams(
            dimension_semantics=("parallel",),
            vmem_limit_bytes=_VMEM_LIMIT_BYTES,
        ),
        cost_estimate=pl.CostEstimate(
            flops=padded_n,
            transcendentals=0,
            bytes_accessed=2 * padded_n * itemsize,
        ),
    )(flat.reshape(rows, _LANES))

    out = out2d.reshape(-1)
    if needs_pad:
        out = out[:n]
    return out.reshape(orig_shape)


def _ref_binarize(x):
    one = jnp.ones((), dtype=x.dtype)
    return jnp.where(x >= 0, one, -one)


if __name__ == "__main__":
    key = jax.random.PRNGKey(0)
    k0, k1, k2, k3 = jax.random.split(key, 4)

    # 1) Small NCHW input consistent with the module (XLA fast path).
    x_small = jax.random.normal(k0, (2, 4, 16, 16), dtype=jnp.float32)
    y_small = binarize(x_small)
    jax.block_until_ready(y_small)
    assert y_small.shape == x_small.shape and y_small.dtype == x_small.dtype
    assert bool(jnp.all(y_small == _ref_binarize(x_small)))

    # 2) Same small input, forced through the Pallas kernel (aligned, no pad).
    y_small_k = binarize(x_small, force_pallas=True)
    jax.block_until_ready(y_small_k)
    assert y_small_k.shape == x_small.shape and y_small_k.dtype == x_small.dtype
    assert bool(jnp.all(y_small_k == _ref_binarize(x_small)))

    # 3) Larger aligned activation -> auto Pallas path, multi-step grid, no pad.
    x_big = jax.random.normal(k1, (8, 16, 128, 128), dtype=jnp.float32)
    y_big = binarize(x_big)
    jax.block_until_ready(y_big)
    assert y_big.shape == x_big.shape and y_big.dtype == x_big.dtype
    assert bool(jnp.all(y_big == _ref_binarize(x_big)))

    # 4) Unaligned bf16 input forced through the kernel -> pad/slice path with
    #    dtype-aware (16,128) sublane tiling.
    x_odd = jax.random.normal(k2, (5, 9, 73, 101), dtype=jnp.bfloat16)
    y_odd = binarize(x_odd, force_pallas=True)
    jax.block_until_ready(y_odd)
    assert y_odd.shape == x_odd.shape and y_odd.dtype == x_odd.dtype
    assert bool(jnp.all(y_odd == _ref_binarize(x_odd)))

    # 5) Exact zeros map to +1 (matches x >= 0 semantics of the reference).
    x_zero = jnp.zeros((2, 4, 16, 16), dtype=jnp.float32)
    y_zero = binarize(x_zero, force_pallas=True)
    jax.block_until_ready(y_zero)
    assert bool(jnp.all(y_zero == 1.0))

    print("KERNEL_OK")
</pallas_src>

<mosaic_0001>
module attributes {stable_mosaic.version = 11 : i64} {
  func.func @_binarize_kernel(%arg0: i32, %arg1: memref<16x128xf32, #tpu.memory_space<vmem>>, %arg2: memref<16x128xf32, #tpu.memory_space<vmem>>) attributes {dimension_semantics = [#tpu.dimension_semantics<parallel>], iteration_bounds = array<i64: 1>, scalar_prefetch = 0 : i64, scratch_operands = 0 : i64, tpu.core_type = #tpu.core_type<tc>, window_params = [{transform_indices = @transform_0, window_bounds = array<i64: 16, 128>}, {transform_indices = @transform_1, window_bounds = array<i64: 16, 128>}]} {
    %c0 = arith.constant 0 : index
    %c0_0 = arith.constant 0 : index
    %0 = vector.load %arg1[%c0, %c0_0] : memref<16x128xf32, #tpu.memory_space<vmem>>, vector<16x128xf32>
    %cst = arith.constant 0.000000e+00 : f32
    %1 = vector.broadcast %cst : f32 to vector<16x128xf32>
    %2 = arith.cmpf oge, %0, %1 : vector<16x128xf32>
    %cst_1 = arith.constant 0.000000e+00 : f32
    %cst_2 = arith.constant 1.000000e+00 : f32
    %3 = arith.subf %cst_1, %cst_2 : f32
    %cst_3 = arith.constant 1.000000e+00 : f32
    %4 = vector.broadcast %cst_3 : f32 to vector<16x128xf32>
    %5 = vector.broadcast %3 : f32 to vector<16x128xf32>
    %6 = arith.select %2, %4, %5 : vector<16x128xi1>, vector<16x128xf32>
    %c0_4 = arith.constant 0 : index
    %c0_5 = arith.constant 0 : index
    %7 = vector.load %arg2[%c0_4, %c0_5] : memref<16x128xf32, #tpu.memory_space<vmem>>, vector<16x128xf32>
    tpu.vector_store %arg2[%c0_4, %c0_5], %6 {strides = array<i32>} : memref<16x128xf32, #tpu.memory_space<vmem>>, vector<16x128xf32>,
    return
  }
  func.func @transform_0(%arg0: i32) -> (i32, i32) {
    %c0_i32 = arith.constant 0 : i32
    %c0_i32_0 = arith.constant 0 : i32
    return %arg0, %c0_i32 : i32, i32
  }
  func.func @transform_1(%arg0: i32) -> (i32, i32) {
    %c0_i32 = arith.constant 0 : i32
    %c0_i32_0 = arith.constant 0 : i32
    return %arg0, %c0_i32 : i32, i32
  }
}

</mosaic_0001>

<bundles_post_ra>
// kernel: tpu_custom_call.1
= control target key start
LH: loop header
LB: loop body
LE: loop exit
PB: predicated region body
PF: predicated region fallthrough
CT: control target
= control target key end

     0   :  { %6 = vsyncpa [#allocation3], 0  ;;  %s146_s0 = inlined_call_operand.hbm [shape: f32[16,128], index: 0, kind: input, shape index: {}]   ;;  %s147_s1 = inlined_call_operand.hbm [shape: f32[16,128], index: 1, kind: output, shape index: {}]  }
   0x1   :  { %7 = vsyncpa [#allocation4], 0  ;;  %s101_s6 = smov [#allocation2]   ;;  %s53_s10 = scalar_lea.hbm %s146_s0, 256 }
   0x2   :  { %s13_s7 = sshll.u32 %s101_s6, 4  ;;  %p54_p0 = scmp.ne.s32.totalorder %s146_s0, %s53_s10  ;;  %s14_s7 = int_to_ptr.vmem [resolvable:$true] %s13_s7 }
   0x3   :  { %p57_p1 = scmp.lt.u32.totalorder %s53_s10, %s146_s0 }
   0x5   :  { %p59_p2 = pnand %p57_p1, %p54_p0 }
   0x7   :  { %62 = shalt.err (!%p59_p2)
}
   0x8   :  { %s63_s15 = scalar_lea.vmem %s14_s7, 256  ;;  %p68_p4 = scmp.lt.s32.totalorder %s14_s7, %s14_s7 }
   0x9   :  { %p64_p3 = scmp.ne.s32.totalorder %s14_s7, %s63_s15  ;;  %p69_p5 = scmp.lt.s32.totalorder %s63_s15, %s63_s15 }
   0xb   :  { %p70_p6 = por %p69_p5, %p68_p4 }
   0xd   :  { %p71_p7 = pnand %p70_p6, %p64_p3 }
   0xf   :  { %74 = shalt.err (!%p71_p7)
}
  0x10   :  { %s102_s16 = smov 128   ;;  %s103_s17 = smov 8  }
  0x11   :  { %19 = dma.hbm_to_vmem [thread:$0]  %s146_s0, 256, %s14_s7, [#allocation3], %s102_s16, %s102_s16, %s103_s17  }
  0x12   :  { %97 = dma.done.wait [#allocation3], 256  }
  0x13   :  { %98 = vsyncadd [#allocation3], 4294967040  ;;  %s104_s20 = smov [#allocation5]   ;;  %v23_v0 = vld [vmem:[#allocation2] sm:$0xff]  ;;  %v24_v1 = vld [vmem:[#allocation2 + $0x8] sm:$0xff]  ;;  %v105_v2 = vmov -1.0  }
  0x14   :  { %s36_s21 = sshll.u32 %s104_s20, 4  ;;  %vm25_vm0 = vcmp.ge.f32.partialorder %v23_v0, 0.0  ;;  %vm26_vm1 = vcmp.ge.f32.partialorder %v24_v1, 0.0  ;;  %s37_s21 = int_to_ptr.vmem [resolvable:$true] %s36_s21 }
  0x15   :  { %v27_v3 = vsel %vm25_vm0, 1.0, %v105_v2  ;;  %v28_v4 = vsel %vm26_vm1, 1.0, %v105_v2  ;;  %s75_s22 = scalar_lea.vmem %s37_s21, 256  ;;  %p80_p9 = scmp.lt.s32.totalorder %s37_s21, %s37_s21 }
  0x16   :  { %29 = vst [vmem:[#allocation5] sm:$0xff] %v27_v3  ;;  %30 = vst [vmem:[#allocation5 + $0x8] sm:$0xff] %v28_v4  ;;  %p76_p8 = scmp.ne.s32.totalorder %s37_s21, %s75_s22  ;;  %p81_p10 = scmp.lt.s32.totalorder %s75_s22, %s75_s22 }
  0x18   :  { %p82_p11 = por %p81_p10, %p80_p9 }
  0x1a   :  { %p83_p12 = pnand %p82_p11, %p76_p8 }
  0x1c   :  { %86 = shalt.err (!%p83_p12)
}
  0x1d   :  { %s87_s24 = scalar_lea.hbm %s147_s1, 256 }
  0x1e   :  { %p88_p13 = scmp.ne.s32.totalorder %s147_s1, %s87_s24  ;;  %p91_p0 = scmp.lt.u32.totalorder %s87_s24, %s147_s1 }
  0x20   :  { %p93_p1 = pnand %p91_p0, %p88_p13 }
  0x22   :  { %96 = shalt.err (!%p93_p1)
}
  0x23   :  { %42 = dma.vmem_to_hbm [thread:$0]  %s37_s21, 256, %s147_s1, [#allocation4], %s102_s16, %s102_s16, %s103_s17  }
  0x24   :  { %99 = dma.done.wait [#allocation4], 256  }
  0x25   :  { %100 = vsyncadd [#allocation4], 4294967040 }
  0x26   :  { %46 = vsyncpa [#allocation3], 1 }
  0x27   :  { %47 = vsyncpa [#allocation4], 1 }

</bundles_post_ra>
